<compile_context>
chip_gen: v7x
topology: tpu7x:2x2x1
jax: 0.10.0
libtpu: 0.0.40
codegen_flags: <defaults>
</compile_context>

<pallas_src>
import jax
import jax.numpy as jnp
from jax.experimental import pallas as pl
from jax.experimental.pallas import tpu as pltpu

EPS = 1e-5
# Set to jnp.bfloat16 on v6e/v7x for 2x MXU throughput / half the matmul-operand VMEM
# (keep f32 here for strict parity with the f32 reference).
MATMUL_DTYPE = jnp.float32


# --------------------------------------------------------------------------- helpers
def _pick_tile(length):
    for t in (2048, 1024, 512, 256, 128):
        if length % t == 0:
            return t
    return length


def _compiler_params(semantics):
    return pltpu.CompilerParams(
        dimension_semantics=semantics,
        vmem_limit_bytes=32 * 1024 * 1024,
    )


def _full_spec(shape):
    # whole (small) array as one block, same block for every grid point
    return pl.BlockSpec(shape, lambda *_: (0,) * len(shape))


def _bn_scale_shift(stats, gamma, beta, inv_count):
    # stats: (C, 2) = [sum | sumsq] accumulated over the whole batch (training-mode BN).
    mean = stats[:, 0:1] * inv_count
    var = stats[:, 1:2] * inv_count - mean * mean
    scale = gamma * jax.lax.rsqrt(var + EPS)
    shift = beta - mean * scale
    return scale, shift


def _edge_masks(H, W):
    cols = jnp.arange(H * W, dtype=jnp.int32) % W
    rows = jnp.arange(H * W, dtype=jnp.int32) // W
    keep_c = (cols < (W - 1)).astype(jnp.float32)   # 0 on the last column
    keep_r = (rows < (H - 1)).astype(jnp.float32)   # 0 on the last row
    return jnp.stack([keep_c, keep_r], axis=0)      # (2, H*W)


# ------------------------------------------------------------------- pass 1: conv1 + BN1 stats
def _conv1_kernel(x_ref, w1_ref, b1_ref, y_ref, s1_ref):
    first = jnp.logical_and(pl.program_id(0) == 0, pl.program_id(1) == 0)

    @pl.when(first)
    def _():
        s1_ref[...] = jnp.zeros_like(s1_ref)

    y = jnp.dot(w1_ref[...].astype(MATMUL_DTYPE), x_ref[...].astype(MATMUL_DTYPE),
                preferred_element_type=jnp.float32) + b1_ref[...]
    y_ref[...] = y
    s1_ref[:, 0:1] += jnp.sum(y, axis=1, keepdims=True)
    s1_ref[:, 1:2] += jnp.sum(y * y, axis=1, keepdims=True)


# ---------------------------------------------- pass 2: BN1+ReLU -> deconv2 (phase-major) + BN2 stats
def _make_deconv_kernel(C4, H, W, PAD, n_pix1):
    HW = H * W
    inv_count1 = 1.0 / float(n_pix1)

    def kernel(y_ref, s1_ref, g1_ref, be1_ref, w2_ref, b2_ref, mask_ref,
               z_ref, s2_ref, yp_ref):
        @pl.when(pl.program_id(0) == 0)
        def _():
            s2_ref[...] = jnp.zeros_like(s2_ref)

        scale1, shift1 = _bn_scale_shift(s1_ref[...], g1_ref[...], be1_ref[...],
                                         inv_count1)
        y = jnp.maximum(y_ref[...] * scale1 + shift1, 0.0)          # (C4, HW)

        # Zero-padded scratch -> shifted views y[m,p+1], y[m+1,p], y[m+1,p+1]
        # (edge contributions removed with precomputed lane masks).
        yp_ref[:, 0:HW] = y
        yp_ref[:, HW:HW + PAD] = jnp.zeros((C4, PAD), jnp.float32)
        keep_c = mask_ref[0:1, :]
        keep_r = mask_ref[1:2, :]
        y_r = yp_ref[:, 1:HW + 1] * keep_c
        y_d = yp_ref[:, W:HW + W] * keep_r
        y_dr = yp_ref[:, W + 1:HW + W + 1] * (keep_c * keep_r)

        w2 = w2_ref[...]                                            # (4*C4, 4*C4)

        def tapdot(wcols, a):
            return jnp.dot(wcols.astype(MATMUL_DTYPE), a.astype(MATMUL_DTYPE),
                           preferred_element_type=jnp.float32)

        # 4 output-stacked dots (all 4 output phases per dot) instead of 9 tiny taps.
        z4 = (tapdot(w2[:, 0 * C4:1 * C4], y)
              + tapdot(w2[:, 1 * C4:2 * C4], y_r)
              + tapdot(w2[:, 2 * C4:3 * C4], y_d)
              + tapdot(w2[:, 3 * C4:4 * C4], y_dr)
              + b2_ref[...])                                        # (4*C4, HW)
        z_ref[...] = z4

        ssum = jnp.sum(z4, axis=1, keepdims=True)                   # (4*C4, 1)
        ssq = jnp.sum(z4 * z4, axis=1, keepdims=True)
        s2_ref[:, 0:1] += (ssum[0:C4] + ssum[C4:2 * C4]
                           + ssum[2 * C4:3 * C4] + ssum[3 * C4:4 * C4])
        s2_ref[:, 1:2] += (ssq[0:C4] + ssq[C4:2 * C4]
                           + ssq[2 * C4:3 * C4] + ssq[3 * C4:4 * C4])

    return kernel


# ------------------------------------------------------ pass 3: BN2+ReLU -> conv3 + BN3 stats
def _make_bn_conv_kernel(n_pix2):
    inv_count2 = 1.0 / float(n_pix2)

    def kernel(z_ref, s2_ref, g2_ref, be2_ref, w3_ref, b3_ref, w_ref, s3_ref):
        first = ((pl.program_id(0) == 0) & (pl.program_id(1) == 0)
                 & (pl.program_id(2) == 0))

        @pl.when(first)
        def _():
            s3_ref[...] = jnp.zeros_like(s3_ref)

        scale2, shift2 = _bn_scale_shift(s2_ref[...], g2_ref[...], be2_ref[...],
                                         inv_count2)
        z = jnp.maximum(z_ref[...] * scale2 + shift2, 0.0)
        w = jnp.dot(w3_ref[...].astype(MATMUL_DTYPE), z.astype(MATMUL_DTYPE),
                    preferred_element_type=jnp.float32) + b3_ref[...]
        w_ref[...] = w
        s3_ref[:, 0:1] += jnp.sum(w, axis=1, keepdims=True)
        s3_ref[:, 1:2] += jnp.sum(w * w, axis=1, keepdims=True)

    return kernel


# ---------------------------------------------------------------------- pass 4: BN3 + ReLU
def _make_bn_relu_kernel(n_pix3):
    inv_count3 = 1.0 / float(n_pix3)

    def kernel(w_ref, s3_ref, g3_ref, be3_ref, o_ref):
        scale3, shift3 = _bn_scale_shift(s3_ref[...], g3_ref[...], be3_ref[...],
                                         inv_count3)
        o_ref[...] = jnp.maximum(w_ref[...] * scale3 + shift3, 0.0)

    return kernel


# ------------------------------------------------------------------------------ wrapper
def decoder_block_forward(x_nchw, kp):
    """x_nchw: (N, Cin, H, W) float32.  Returns (N, NF, 2H, 2W) float32."""
    N, Cin, H, W = x_nchw.shape
    C4 = kp["w1"].shape[0]
    NF = kp["w3"].shape[0]
    HW = H * W
    f32 = jnp.float32

    # free reshape: NCHW is already (channel, H*W)-major per sample
    x = x_nchw.reshape(N, Cin, HW).astype(f32)

    # ------------------------- pass 1: conv1 (1x1) + BN1 statistics ----------------------
    T1 = _pick_tile(HW)
    y_pre, s1 = pl.pallas_call(
        _conv1_kernel,
        out_shape=(jax.ShapeDtypeStruct((N, C4, HW), f32),
                   jax.ShapeDtypeStruct((C4, 2), f32)),
        grid_spec=pltpu.PrefetchScalarGridSpec(
            num_scalar_prefetch=0,
            grid=(N, HW // T1),
            in_specs=[
                pl.BlockSpec((None, Cin, T1), lambda n, t: (n, 0, t)),
                _full_spec((C4, Cin)),
                _full_spec((C4, 1)),
            ],
            out_specs=(
                pl.BlockSpec((None, C4, T1), lambda n, t: (n, 0, t)),
                _full_spec((C4, 2)),
            ),
        ),
        compiler_params=_compiler_params(("arbitrary", "arbitrary")),
    )(x, kp["w1"], kp["b1"])

    # -------------- pass 2: BN1+ReLU -> ConvTranspose2d(3,stride=2) + BN2 statistics -----
    PAD = ((W + 1 + 127) // 128) * 128
    mask = _edge_masks(H, W)
    z_pre, s2 = pl.pallas_call(
        _make_deconv_kernel(C4, H, W, PAD, N * HW),
        out_shape=(jax.ShapeDtypeStruct((N, 4 * C4, HW), f32),
                   jax.ShapeDtypeStruct((C4, 2), f32)),
        grid_spec=pltpu.PrefetchScalarGridSpec(
            num_scalar_prefetch=0,
            grid=(N,),
            in_specs=[
                pl.BlockSpec((None, C4, HW), lambda n: (n, 0, 0)),
                _full_spec((C4, 2)),
                _full_spec((C4, 1)),
                _full_spec((C4, 1)),
                _full_spec((4 * C4, 4 * C4)),
                _full_spec((4 * C4, 1)),
                _full_spec((2, HW)),
            ],
            out_specs=(
                pl.BlockSpec((None, 4 * C4, HW), lambda n: (n, 0, 0)),
                _full_spec((C4, 2)),
            ),
            scratch_shapes=[pltpu.VMEM((C4, HW + PAD), f32)],
        ),
        compiler_params=_compiler_params(("arbitrary",)),
    )(y_pre, s1, kp["g1"], kp["be1"], kp["w2"], kp["b2"], mask)

    # ------------------- pass 3: BN2+ReLU -> conv3 (1x1) + BN3 statistics ----------------
    z4d = z_pre.reshape(N, 4, C4, HW)      # free split of the phase-major channel axis
    T2 = _pick_tile(HW)
    w_pre, s3 = pl.pallas_call(
        _make_bn_conv_kernel(N * 4 * HW),
        out_shape=(jax.ShapeDtypeStruct((N, 4, NF, HW), f32),
                   jax.ShapeDtypeStruct((NF, 2), f32)),
        grid_spec=pltpu.PrefetchScalarGridSpec(
            num_scalar_prefetch=0,
            grid=(N, 4, HW // T2),
            in_specs=[
                pl.BlockSpec((None, None, C4, T2), lambda n, f, t: (n, f, 0, t)),
                _full_spec((C4, 2)),
                _full_spec((C4, 1)),
                _full_spec((C4, 1)),
                _full_spec((NF, C4)),
                _full_spec((NF, 1)),
            ],
            out_specs=(
                pl.BlockSpec((None, None, NF, T2), lambda n, f, t: (n, f, 0, t)),
                _full_spec((NF, 2)),
            ),
        ),
        compiler_params=_compiler_params(("arbitrary", "arbitrary", "arbitrary")),
    )(z4d, s2, kp["g2"], kp["be2"], kp["w3"], kp["b3"])

    # --------------------------------- pass 4: BN3 + ReLU --------------------------------
    out_pm = pl.pallas_call(
        _make_bn_relu_kernel(N * 4 * HW),
        out_shape=jax.ShapeDtypeStruct((N, 4, NF, HW), f32),
        grid_spec=pltpu.PrefetchScalarGridSpec(
            num_scalar_prefetch=0,
            grid=(N, 4, HW // T2),
            in_specs=[
                pl.BlockSpec((None, None, NF, T2), lambda n, f, t: (n, f, 0, t)),
                _full_spec((NF, 2)),
                _full_spec((NF, 1)),
                _full_spec((NF, 1)),
            ],
            out_specs=pl.BlockSpec((None, None, NF, T2),
                                   lambda n, f, t: (n, f, 0, t)),
        ),
        compiler_params=_compiler_params(("parallel", "parallel", "parallel")),
    )(w_pre, s3, kp["g3"], kp["be3"])

    # TODO(synk): the stride-2 phase->spatial interleave below is the only remaining
    # wrapper-side data movement; a strided scatter is not expressible with BlockSpec.
    out = out_pm.reshape(N, 2, 2, NF, H, W)
    out = jnp.transpose(out, (0, 3, 4, 1, 5, 2))     # (N, NF, H, ph, W, pw)
    return out.reshape(N, NF, 2 * H, 2 * W)


# ----------------------------------- parameters ----------------------------------------
def init_params(key, in_channels, n_filters):
    C4 = in_channels // 4
    ks = jax.random.split(key, 12)
    raw = {
        "conv1_w": 0.1 * jax.random.normal(ks[0], (C4, in_channels, 1, 1), jnp.float32),
        "conv1_b": 0.1 * jax.random.normal(ks[1], (C4,), jnp.float32),
        "bn1_g": 1.0 + 0.1 * jax.random.normal(ks[2], (C4,), jnp.float32),
        "bn1_b": 0.1 * jax.random.normal(ks[3], (C4,), jnp.float32),
        "deconv2_w": 0.1 * jax.random.normal(ks[4], (C4, C4, 3, 3), jnp.float32),
        "deconv2_b": 0.1 * jax.random.normal(ks[5], (C4,), jnp.float32),
        "bn2_g": 1.0 + 0.1 * jax.random.normal(ks[6], (C4,), jnp.float32),
        "bn2_b": 0.1 * jax.random.normal(ks[7], (C4,), jnp.float32),
        "conv3_w": 0.1 * jax.random.normal(ks[8], (n_filters, C4, 1, 1), jnp.float32),
        "conv3_b": 0.1 * jax.random.normal(ks[9], (n_filters,), jnp.float32),
        "bn3_g": 1.0 + 0.1 * jax.random.normal(ks[10], (n_filters,), jnp.float32),
        "bn3_b": 0.1 * jax.random.normal(ks[11], (n_filters,), jnp.float32),
    }

    # Stacked deconv weight: rows = output phases [ee | eo | oe | oo] (C4 each),
    # cols = tap sources    [y  | y_r | y_d | y_dr] (C4 each).
    def tapT(kh, kw):
        return raw["deconv2_w"][:, :, kh, kw].T          # (C4_out, C4_in)

    Z = jnp.zeros((C4, C4), jnp.float32)
    w2big = jnp.concatenate([
        jnp.concatenate([tapT(1, 1), Z,          Z,          Z         ], axis=1),
        jnp.concatenate([tapT(1, 2), tapT(1, 0), Z,          Z         ], axis=1),
        jnp.concatenate([tapT(2, 1), Z,          tapT(0, 1), Z         ], axis=1),
        jnp.concatenate([tapT(2, 2), tapT(2, 0), tapT(0, 2), tapT(0, 0)], axis=1),
    ], axis=0)                                           # (4*C4, 4*C4)

    kp = {
        "w1": raw["conv1_w"][:, :, 0, 0],                            # (C4, Cin)
        "b1": raw["conv1_b"].reshape(C4, 1),
        "g1": raw["bn1_g"].reshape(C4, 1),
        "be1": raw["bn1_b"].reshape(C4, 1),
        "w2": w2big,
        "b2": jnp.tile(raw["deconv2_b"].reshape(1, C4), (4, 1)).reshape(4 * C4, 1),
        "g2": raw["bn2_g"].reshape(C4, 1),
        "be2": raw["bn2_b"].reshape(C4, 1),
        "w3": raw["conv3_w"][:, :, 0, 0],                            # (NF, C4)
        "b3": raw["conv3_b"].reshape(n_filters, 1),
        "g3": raw["bn3_g"].reshape(n_filters, 1),
        "be3": raw["bn3_b"].reshape(n_filters, 1),
    }
    return raw, kp


# --------------------------------- pure-JAX reference ------------------------------------
def reference_forward(x, raw):
    dn = ("NCHW", "OIHW", "NCHW")

    def bn_relu(y, g, b):
        mu = jnp.mean(y, axis=(0, 2, 3), keepdims=True)
        var = jnp.mean((y - mu) ** 2, axis=(0, 2, 3), keepdims=True)
        yn = (y - mu) / jnp.sqrt(var + EPS) * g[None, :, None, None] + b[None, :, None, None]
        return jnp.maximum(yn, 0.0)

    y = jax.lax.conv_general_dilated(x, raw["conv1_w"], (1, 1), "VALID",
                                     dimension_numbers=dn)
    y = y + raw["conv1_b"][None, :, None, None]
    y = bn_relu(y, raw["bn1_g"], raw["bn1_b"])

    # ConvTranspose2d(3, stride=2, pad=1, output_pad=1) as a dilated conv.
    w_conv = jnp.flip(jnp.transpose(raw["deconv2_w"], (1, 0, 2, 3)), axis=(2, 3))
    y = jax.lax.conv_general_dilated(y, w_conv, (1, 1), [(1, 2), (1, 2)],
                                     lhs_dilation=(2, 2), dimension_numbers=dn)
    y = y + raw["deconv2_b"][None, :, None, None]
    y = bn_relu(y, raw["bn2_g"], raw["bn2_b"])

    y = jax.lax.conv_general_dilated(y, raw["conv3_w"], (1, 1), "VALID",
                                     dimension_numbers=dn)
    y = y + raw["conv3_b"][None, :, None, None]
    y = bn_relu(y, raw["bn3_g"], raw["bn3_b"])
    return y


if __name__ == "__main__":
    N, Cin, H, W = 2, 16, 16, 16
    n_filters = 8

    key = jax.random.PRNGKey(0)
    k_x, k_p = jax.random.split(key)
    x = jax.random.normal(k_x, (N, Cin, H, W), jnp.float32)

    raw, kp = init_params(k_p, Cin, n_filters)

    out = decoder_block_forward(x, kp)
    out = jax.block_until_ready(out)

    ref = jax.block_until_ready(reference_forward(x, raw))

    assert out.shape == (N, n_filters, 2 * H, 2 * W), out.shape
    max_err = float(jnp.max(jnp.abs(out - ref)))
    if max_err > 2e-4:
        raise AssertionError(f"kernel mismatch vs reference: max_err={max_err}")

    print("KERNEL_OK")
</pallas_src>

<mosaic_0001>
module attributes {stable_mosaic.version = 11 : i64} {
  func.func @_conv1_kernel(%arg0: i32, %arg1: i32, %arg2: memref<1x16x256xf32, #tpu.memory_space<vmem>>, %arg3: memref<4x16xf32, #tpu.memory_space<vmem>>, %arg4: memref<4x1xf32, #tpu.memory_space<vmem>>, %arg5: memref<1x4x256xf32, #tpu.memory_space<vmem>>, %arg6: memref<4x2xf32, #tpu.memory_space<vmem>>) attributes {dimension_semantics = [#tpu.dimension_semantics<arbitrary>, #tpu.dimension_semantics<arbitrary>], iteration_bounds = array<i64: 2, 1>, scalar_prefetch = 0 : i64, scratch_operands = 0 : i64, tpu.core_type = #tpu.core_type<tc>, window_params = [{transform_indices = @transform_0, window_bounds = array<i64: 1, 16, 256>}, {pipeline_mode = #tpu.pipeline_mode<synchronous>, transform_indices = @transform_1, window_bounds = array<i64: 4, 16>}, {pipeline_mode = #tpu.pipeline_mode<synchronous>, transform_indices = @transform_2, window_bounds = array<i64: 4, 1>}, {transform_indices = @transform_3, window_bounds = array<i64: 1, 4, 256>}, {pipeline_mode = #tpu.pipeline_mode<synchronous>, transform_indices = @transform_4, window_bounds = array<i64: 4, 2>}]} {
    %c0_i32 = arith.constant 0 : i32
    %0 = arith.cmpi eq, %arg0, %c0_i32 : i32
    %c0_i32_0 = arith.constant 0 : i32
    %1 = arith.cmpi eq, %arg1, %c0_i32_0 : i32
    %2 = arith.andi %0, %1 : i1
    %3 = arith.extui %2 : i1 to i32
    %c0_i32_1 = arith.constant 0 : i32
    %4 = arith.cmpi ne, %3, %c0_i32_1 : i32
    scf.if %4 {
      %cst_20 = arith.constant 0.000000e+00 : f32
      %26 = vector.broadcast %cst_20 : f32 to vector<4x2xf32>
      %c0_21 = arith.constant 0 : index
      %c0_22 = arith.constant 0 : index
      %27 = vector.load %arg6[%c0_21, %c0_22] : memref<4x2xf32, #tpu.memory_space<vmem>>, vector<4x2xf32>
      tpu.vector_store %arg6[%c0_21, %c0_22], %26 {strides = array<i32>} : memref<4x2xf32, #tpu.memory_space<vmem>>, vector<4x2xf32>,
    } else {
    }
    %c0 = arith.constant 0 : index
    %c0_2 = arith.constant 0 : index
    %5 = vector.load %arg3[%c0, %c0_2] : memref<4x16xf32, #tpu.memory_space<vmem>>, vector<4x16xf32>
    %c0_3 = arith.constant 0 : index
    %c0_4 = arith.constant 0 : index
    %c0_5 = arith.constant 0 : index
    %6 = vector.load %arg2[%c0_3, %c0_4, %c0_5] : memref<1x16x256xf32, #tpu.memory_space<vmem>>, vector<1x16x256xf32>
    %7 = vector.shape_cast %6 : vector<1x16x256xf32> to vector<16x256xf32>
    %cst = arith.constant dense<0.000000e+00> : vector<4x256xf32>
    %8 = tpu.matmul %5, %7, %cst {dimension_numbers = #tpu.dot_dimension_numbers<[1], [0], [0], [1], [0, 0, 1, 1], [], []>} : vector<4x16xf32>, vector<16x256xf32>, vector<4x256xf32> -> vector<4x256xf32>
    %c0_6 = arith.constant 0 : index
    %c0_7 = arith.constant 0 : index
    %9 = vector.load %arg4[%c0_6, %c0_7] : memref<4x1xf32, #tpu.memory_space<vmem>>, vector<4x1xf32>
    %10 = vector.broadcast %9 : vector<4x1xf32> to vector<4x256xf32>
    %11 = arith.addf %8, %10 : vector<4x256xf32>
    %c0_8 = arith.constant 0 : index
    %c0_9 = arith.constant 0 : index
    %c0_10 = arith.constant 0 : index
    %12 = vector.load %arg5[%c0_8, %c0_9, %c0_10] : memref<1x4x256xf32, #tpu.memory_space<vmem>>, vector<1x4x256xf32>
    %13 = vector.shape_cast %12 : vector<1x4x256xf32> to vector<4x256xf32>
    %14 = vector.shape_cast %11 : vector<4x256xf32> to vector<1x4x256xf32>
    tpu.vector_store %arg5[%c0_8, %c0_9, %c0_10], %14 {strides = array<i32>} : memref<1x4x256xf32, #tpu.memory_space<vmem>>, vector<1x4x256xf32>,
    %c0_11 = arith.constant 0 : index
    %c0_12 = arith.constant 0 : index
    %15 = vector.load %arg6[%c0_11, %c0_12] : memref<4x2xf32, #tpu.memory_space<vmem>>, vector<4x1xf32>
    %cst_13 = arith.constant dense<0.000000e+00> : vector<4xf32>
    %16 = vector.multi_reduction <add>, %11, %cst_13 [1] : vector<4x256xf32> to vector<4xf32>
    %17 = vector.shape_cast %16 : vector<4xf32> to vector<4x1xf32>
    %18 = arith.addf %15, %17 : vector<4x1xf32>
    %c0_14 = arith.constant 0 : index
    %c0_15 = arith.constant 0 : index
    %19 = vector.load %arg6[%c0_14, %c0_15] : memref<4x2xf32, #tpu.memory_space<vmem>>, vector<4x1xf32>
    tpu.vector_store %arg6[%c0_14, %c0_15], %18 {strides = array<i32>} : memref<4x2xf32, #tpu.memory_space<vmem>>, vector<4x1xf32>,
    %c0_16 = arith.constant 0 : index
    %c1 = arith.constant 1 : index
    %20 = vector.load %arg6[%c0_16, %c1] : memref<4x2xf32, #tpu.memory_space<vmem>>, vector<4x1xf32>
    %21 = arith.mulf %11, %11 : vector<4x256xf32>
    %cst_17 = arith.constant dense<0.000000e+00> : vector<4xf32>
    %22 = vector.multi_reduction <add>, %21, %cst_17 [1] : vector<4x256xf32> to vector<4xf32>
    %23 = vector.shape_cast %22 : vector<4xf32> to vector<4x1xf32>
    %24 = arith.addf %20, %23 : vector<4x1xf32>
    %c0_18 = arith.constant 0 : index
    %c1_19 = arith.constant 1 : index
    %25 = vector.load %arg6[%c0_18, %c1_19] : memref<4x2xf32, #tpu.memory_space<vmem>>, vector<4x1xf32>
    tpu.vector_store %arg6[%c0_18, %c1_19], %24 {strides = array<i32>} : memref<4x2xf32, #tpu.memory_space<vmem>>, vector<4x1xf32>,
    return
  }
  func.func @transform_0(%arg0: i32, %arg1: i32) -> (i32, i32, i32) {
    %c0_i32 = arith.constant 0 : i32
    %c0_i32_0 = arith.constant 0 : i32
    return %arg0, %c0_i32, %arg1 : i32, i32, i32
  }
  func.func @transform_1(%arg0: i32, %arg1: i32) -> (i32, i32) {
    %c0_i32 = arith.constant 0 : i32
    %c0_i32_0 = arith.constant 0 : i32
    %c0_i32_1 = arith.constant 0 : i32
    return %c0_i32, %c0_i32_0 : i32, i32
  }
  func.func @transform_2(%arg0: i32, %arg1: i32) -> (i32, i32) {
    %c0_i32 = arith.constant 0 : i32
    %c0_i32_0 = arith.constant 0 : i32
    %c0_i32_1 = arith.constant 0 : i32
    return %c0_i32, %c0_i32_0 : i32, i32
  }
  func.func @transform_3(%arg0: i32, %arg1: i32) -> (i32, i32, i32) {
    %c0_i32 = arith.constant 0 : i32
    %c0_i32_0 = arith.constant 0 : i32
    return %arg0, %c0_i32, %arg1 : i32, i32, i32
  }
  func.func @transform_4(%arg0: i32, %arg1: i32) -> (i32, i32) {
    %c0_i32 = arith.constant 0 : i32
    %c0_i32_0 = arith.constant 0 : i32
    %c0_i32_1 = arith.constant 0 : i32
    return %c0_i32, %c0_i32_0 : i32, i32
  }
}

</mosaic_0001>

<bundles_post_ra>
// kernel: tpu_custom_call.1
= control target key start
LH: loop header
LB: loop body
LE: loop exit
PB: predicated region body
PF: predicated region fallthrough
CT: control target
= control target key end

     0   :  { %10 = vsyncpa [#allocation3], 0  ;;  %s893_s0 = inlined_call_operand.hbm [shape: f32[2,16,256], index: 0, kind: input, shape index: {}]   ;;  %s894_s1 = inlined_call_operand.vmem [shape: f32[4,16], index: 1, kind: input, shape index: {}]   ;;  %s895_s2 = inlined_call_operand.vmem [shape: f32[4,1], index: 2, kind: input, shape index: {}]   ;;  %s896_s3 = inlined_call_operand.hbm [shape: f32[2,4,256], index: 3, kind: output, shape index: {0}]   ;;  %s897_s4 = inlined_call_operand.vmem [shape: f32[4,2], index: 4, kind: output, shape index: {1}]  }
   0x1   :  { %12 = vsyncpa [#allocation3 + $0x1], 0 }
   0x2   :  { %13 = vsyncpa [#allocation4], 0 }
   0x3   :  { %15 = vsyncpa [#allocation4 + $0x1], 0  ;;  %s699_s15 = smov 0   ;;  %s701_s16 = smov 0  }
   0x4   :  { %s703_s17 = smov 0   ;;  %s705_s18 = smov 0  }
   0x5   :  { %s707_s19 = smov 0   ;;  %s709_s20 = smov 0  }
   0x6 LB: > { %s461_s21 = sadd.s32 4294967295, %s665_s20   ;;  %s462_s22 = sadd.s32 4294967294, %s665_s20   ;;  %s665_s20 = sphi %s709_s20, %s21_s20   ;;  %s661_s19 = sphi %s707_s19, %s912_s19   ;;  %s657_s18 = sphi %s705_s18, %s911_s18   ;;  %s653_s17 = sphi %s703_s17, %s910_s17   ;;  %s649_s16 = sphi %s701_s16, %s909_s16   ;;  %s645_s15 = sphi %s699_s15, %s908_s15  }
   0x7   : > { %s33_s23 = sadd.s32 1, %s661_s19  ;;  %s42_s24 = sadd.s32 1, %s653_s17 }
   0x8   : > { %p35_p0 = scmp.ge.s32.totalorder %s33_s23, 2  ;;  %p49_p1 = scmp.ne.s32.totalorder %s653_s17, %s649_s16 }
   0x9   : > { %p50_p2 = scmp.eq.s32.totalorder %s665_s20, 0  ;;  %p55_p3 = scmp.ne.s32.totalorder %s649_s16, %s645_s15 }
   0xa   : > { %s914_s23 = smov (%p35_p0, %s33_s23), 0  ;;  %p56_p5 = scmp.eq.s32.totalorder %s461_s21, 0 }
   0xb   : > { %p740_p4 = por %p50_p2, %p49_p1  ;;  %s37_s26 = ssub.s32 %s661_s19, %s914_s23 }
   0xc   : > { %p123_p6 = scmp.eq.s32.totalorder %s461_s21, 1  ;;  %p40_p7 = scmp.eq.s32.totalorder %s37_s26, 0 }
   0xd   : > { %p746_p8 = por %p56_p5, %p55_p3  ;;  %p129_p10 = scmp.eq.s32.totalorder %s462_s22, 1 }
   0xe   : > { %p750_p9 = por %p123_p6, %p49_p1  ;;  %p497_p13 = scmp.lt.s32.totalorder %s665_s20, 2 }
   0xf   : > { %s755_s29 = scalar_select %p40_p7, %s653_s17, %s42_s24  }
  0x10   : > { %s901_s28 = scalar_select %p750_p9, 1, 0 }
  0x11   : > { %p757_p11 = por %p129_p10, %p55_p3  ;;  %s176_s5 = sand.u32 1, %s653_s17  }
  0x12   : > { %s465_s6 = sshll.u32 %s176_s5, 5  ;;  %s478_s7 = sshll.u32 %s661_s19, 9 }
  0x13   : > { %s902_s30 = scalar_select %p757_p11, 1, 0 }
  0x14   : > { %s768_s10 = scalar_lea.hbm %s893_s0, %s478_s7  ;;  %s180_s11 = scalar_lea.vmem [#allocation2], %s465_s6 }
  0x15   : > { %s189_s12 = sshll.u32 %s180_s11, 4  ;;  %p774_p0 = pnand %p497_p13, %p740_p4  ;;  %s770_s12 = int_to_ptr.vmem [resolvable:$true] %s189_s12 }
  0x16   : > { %s779_s14 = scalar_lea.sflag [#allocation3], %s176_s5  ;;  %s553_s21 = scalar_lea.hbm %s768_s10, 512 }
  0x17   : > { %p554_p2 = scmp.ne.s32.totalorder %s768_s10, %s553_s21  ;;  %p555_p3 = pneg %p774_p0 }
  0x18   : > { %s558_s25 = scalar_lea.hbm %s893_s0, 1024  ;;  %p559_p4 = scmp.lt.u32.totalorder %s768_s10, %s893_s0 }
  0x19   : > { %p556_p5 = pnand %p555_p3, %p554_p2  ;;  %p560_p7 = scmp.lt.u32.totalorder %s558_s25, %s553_s21 }
  0x1a   : > { %p562_p13 = scmp.lt.u32.totalorder %s553_s21, %s768_s10 }
  0x1b   : > { %p557_p6 = pneg %p556_p5  ;;  %p561_p10 = por %p560_p7, %p559_p4 }
  0x1d   : > { %p563_p12 = por %p562_p13, %p561_p10 }
  0x1f   : > { %p564_p1 = pnand %p563_p12, %p557_p6 }
  0x21   : > { %567 = shalt.err (!%p564_p1)
}
  0x22   : > { %s568_s5 = scalar_lea.vmem %s770_s12, 512  ;;  %s667_s7 = smov [#allocation2]  }
  0x23   : > { %p569_p2 = scmp.ne.s32.totalorder %s770_s12, %s568_s5  ;;  %s573_s8 = sshll.u32 %s667_s7, 4  ;;  %s574_s8 = int_to_ptr.vmem [resolvable:$false] %s573_s8 }
  0x24   : > { %s575_s9 = scalar_lea.vmem %s574_s8, 1024  ;;  %p576_p9 = scmp.lt.s32.totalorder %s770_s12, %s574_s8 }
  0x25   : > { %p571_p5 = pnand %p569_p2, %p555_p3  ;;  %p577_p4 = scmp.lt.s32.totalorder %s575_s9, %s568_s5 }
  0x27   : > { %p572_p11 = pneg %p571_p5  ;;  %p578_p7 = por %p577_p4, %p576_p9 }
  0x29   : > { %p579_p10 = pnand %p578_p7, %p572_p11 }
  0x2b   : > { %582 = shalt.err (!%p579_p10)
}
  0x2c   : > { %s668_s11 = smov 256   ;;  %s669_s21 = smov 16  }
  0x2d   : > { %492 = dma.hbm_to_vmem [thread:$0]  (!%p774_p0), %s768_s10, 512, %s770_s12, %s779_s14, %s668_s11, %s668_s11, %s669_s21  }
  0x2e   : > { %p197_p12 = scmp.lt.s32.totalorder %s665_s20, 3  ;;  %p904_p1 = scmp.ge.s32.totalorder %s665_s20, 1 }
  0x30   : > { %p198_p3 = pnand %p904_p1, %p197_p12 }
  0x31   : > { %s811_s22 = sand.u32 (!%p198_p3), 1, %s649_s16  }
  0x32   : > { %201 = sbr.rel (%p198_p3) target bundleno = 447 (0x1bf), region = 32  ;;  %s469_s24 = sshll.u32 (!%p198_p3), %s811_s22, 5 }
  0x33   : > { %s204_s25 = scalar_lea.sflag (!%p198_p3), [#allocation3], %s811_s22  ;;  %s207_s26 = scalar_lea.vmem (!%p198_p3), [#allocation2], %s469_s24 }
  0x39   : > { %636 = dma.done.wait (%p746_p8), %s204_s25, 512  }
  0x3a   : > { %638 = vsyncadd (%p746_p8), %s204_s25, 4294966784  ;;  %s470_s10 = sshll.u32 %s811_s22, 3  ;;  %p234_p9 = scmp.eq.s32.totalorder %s657_s18, 0 }
  0x3b   : > { %s821_s12 = scalar_lea.vmem [#allocation5], %s470_s10  ;;  %vm240_vm0 = vcmask (%p234_p9), 11264   ;;  %v670_v0 = vmov (%p234_p9), 0.0  }
  0x3c   : > { %239 = sbr.rel (!%p234_p9) target bundleno = 67 (0x43), region = 40  ;;  %241 = vst.msk [vmem:[%s897_s4] sm:$0xf] (%p234_p9), %vm240_vm0, %v670_v0 }
  0x43 PF: > { %v244_v1 = vld [vmem:[%s207_s26 + $0x8] sm:$0xff]  ;;  %v246_v2 = vld [vmem:[%s207_s26 + $0x18] sm:$0xff]  ;;  %v243_v3 = vld [vmem:[%s207_s26] sm:$0xff]  ;;  %v671_v6 = vmov 0.0   ;;  %v672_v7 = vmov 0   ;;  %vm253_vm1 = vcmask 130048  }
  0x44   : > { %v481_v4 = vpack.c.bf16 %v246_v2, %v244_v1  ;;  %v245_v5 = vld [vmem:[%s207_s26 + $0x10] sm:$0xff]  ;;  %321 = vmatprep.mubr.f32.mxu0 %v671_v6  ;;  %552 = vset.pattern.permute.xlu0 %v672_v7  ;;  %v247_v8 = vld [vmem:[%s895_s2] sm:$0xf]  ;;  %vm334_vm2 = vcmask 1043456   ;;  %s480_s8 = sshll.u32 %s657_s18, 7  ;;  %s371_s9 = sshll.u32 %s821_s12, 4  ;;  %s372_s9 = int_to_ptr.vmem [resolvable:$true] %s371_s9 }
  0x45   : > { %v483_v9 = vpack.c.bf16 %v245_v5, %v243_v3  ;;  %250 = vperm.xlu0 %552, %v247_v8   ;;  %v242_v10 = vld [vmem:[%s894_s1] sm:$0xf]  ;;  %s838_s24 = scalar_lea.hbm %s896_s3, %s480_s8  ;;  %s355_s25 = scalar_lea.sflag [#allocation4], %s811_s22 }
  0x46   : > { %482 = vmatprep.subr.bf16.mxu0 %v481_v4  ;;  %s583_s26 = scalar_lea.vmem %s372_s9, 128  ;;  %p905_p11 = scmp.ne.s32.totalorder %s901_s28, 0 }
  0x47   : > { %484 = vmatpush1.bf16.msra.mxu0 %v483_v9  ;;  %p584_p8 = scmp.ne.s32.totalorder %s372_s9, %s583_s26  ;;  %s673_s10 = smov [#allocation5]  }
  0x48   : > { %s587_s13 = sshll.u32 %s673_s10, 4  ;;  %s588_s13 = int_to_ptr.vmem [resolvable:$false] %s587_s13 }
  0x49   : > { %p585_p0 = pnand %p584_p8, %p905_p11  ;;  %s589_s14 = scalar_lea.vmem %s588_s13, 256 }
  0x4a   : > { %472 = vmatmul.mubr.msk.f32.vlgmr.msra.gmra.mrb[0].mxu0 %vm253_vm1, %v242_v10  ;;  %p590_p13 = scmp.lt.s32.totalorder %s372_s9, %s588_s13  ;;  %p591_p2 = scmp.lt.s32.totalorder %s589_s14, %s583_s26 }
  0x4b   : > { %p586_p6 = pneg %p585_p0 }
  0x4c   : > { %p592_p5 = por %p591_p2, %p590_p13 }
  0x4e   : > { %p593_p4 = pnand %p592_p5, %p586_p6 }
  0xc4   : > { %v251_v11 = vpop.permute.xlu0 %250 }
 0x11d   : > { %v323_v12 = vpop.f32.mrb[0].mxu0 }
 0x11e   : > { %v324_v13 = vadd.f32 %v323_v12, %v251_v11  ;;  %v325_v14 = vpop.f32.mrb[1].mxu0 }
 0x11f   : > { %v326_v15 = vadd.f32 %v325_v14, %v251_v11 }
 0x120   : > { %v335_v16 = vsel %vm334_vm2, %v324_v13, 0.0  ;;  %v344_v17 = vmul.f32 %v324_v13, %v324_v13 }
 0x121   : > { %v336_v18 = vsel %vm334_vm2, %v326_v15, 0.0  ;;  %v345_v19 = vmul.f32 %v326_v15, %v326_v15  ;;  %v330_v20 = vcombine.low %v324_v13, %v326_v15 }
 0x122   : > { %v337_v21 = vadd.f32 %v336_v18, %v335_v16  ;;  %v346_v22 = vsel %vm334_vm2, %v344_v17, 0.0 }
 0x123   : > { %v347_v23 = vsel %vm334_vm2, %v345_v19, 0.0  ;;  %332 = vst [vmem:[%s821_s12] sm:$0xff] %v330_v20 }
 0x124   : > { %338 = vadd.xlane.f32.xlu0 %v337_v21  ;;  %v348_v24 = vadd.f32 %v347_v23, %v346_v22 }
 0x126   : > { %349 = vadd.xlane.f32.xlu1 %v348_v24 }
 0x127   : > { %596 = shalt.err (!%p593_p4)
}
 0x128   : > { %s597_s18 = scalar_lea.hbm %s838_s24, 128  ;;  %s601_s27 = scalar_lea.hbm %s896_s3, 256 }
 0x129   : > { %p598_p7 = scmp.ne.s32.totalorder %s838_s24, %s597_s18  ;;  %p602_p1 = scmp.lt.u32.totalorder %s838_s24, %s896_s3 }
 0x12a   : > { %p603_p3 = scmp.lt.u32.totalorder %s601_s27, %s597_s18  ;;  %p605_p8 = scmp.lt.u32.totalorder %s597_s18, %s838_s24 }
 0x12b   : > { %p599_p10 = pnand %p598_p7, %p905_p11 }
 0x12c   : > { %p604_p9 = por %p603_p3, %p602_p1 }
 0x12d   : > { %p600_p12 = pneg %p599_p10 }
 0x12e   : > { %p606_p0 = por %p605_p8, %p604_p9 }
 0x130   : > { %p607_p6 = pnand %p606_p0, %p600_p12 }
 0x132   : > { %610 = shalt.err (!%p607_p6)
}
 0x133   : > { %487 = dma.vmem_to_hbm [thread:$0]  (%p905_p11), %s372_s9, 128, %s838_s24, %s355_s25   ;;  %v333_v25 = vld [vmem:[%s897_s4] sm:$0xf]  ;;  %vm341_vm3 = vcmask 3072   ;;  %vm352_vm4 = vcmask 11272  }
 0x1b1   : > { %v339_v26 = vpop.xlane.xlu0 %338 }
 0x1b2   : > { %v340_v27 = vadd.f32 %v339_v26, %v333_v25 }
 0x1b3   : > { %v350_v28 = vpop.xlane.xlu1 %349 }
 0x1b4   : > { %342 = vst.msk [vmem:[%s897_s4] sm:$0xf] %vm341_vm3, %v340_v27 }
 0x1bb   : > { %v343_v29 = vld [vmem:[%s897_s4] sm:$0xf] }
 0x1bc   : > { %v351_v30 = vadd.f32 %v350_v28, %v343_v29 }
 0x1be   : > { %353 = vst.msk [vmem:[%s897_s4] sm:$0xf] %vm352_vm4, %v351_v30 }
 0x1bf PF: > { %s389_s24 = sand.u32 1, %s645_s15   ;;  %p906_p11 = scmp.ne.s32.totalorder %s902_s30, 0 }
 0x1c0   : > { %p907_p13 = scmp.ge.s32.totalorder %s665_s20, 2  ;;  %s390_s25 = scalar_lea.sflag [#allocation4], %s389_s24 }
 0x1c2   : > { %p494_p2 = pnand %p907_p13, %p906_p11 }
 0x1c4   : > { %640 = dma.done.wait (!%p494_p2), %s390_s25, 128  }
 0x1c5   : > { %642 = vsyncadd (!%p494_p2), %s390_s25, 4294967168  ;;  %s21_s20 = sadd.s32 1, %s665_s20   ;;  %s908_s15 = smov %s649_s16 }
 0x1c6   : > { %p18_p5 = scmp.ge.s32.totalorder %s21_s20, 4   ;;  %s909_s16 = smov %s653_s17 }
 0x1c7   : > { %s910_s17 = smov %s755_s29  ;;  %s911_s18 = smov %s661_s19 }
 0x1c8   : > { %s912_s19 = smov %s914_s23  ;;  %20 = sbr.rel (!%p18_p5) target bundleno = 6 (0x6), region = 89 }
 0x1cf   :  { %395 = vsyncpa [#allocation3], 1 }
 0x1d0   :  { %397 = vsyncpa [#allocation3 + $0x1], 1 }
 0x1d1   :  { %398 = vsyncpa [#allocation4], 1 }
 0x1d2   :  { %400 = vsyncpa [#allocation4 + $0x1], 1 }

</bundles_post_ra>
